<compile_context>
chip_gen: v7x
topology: tpu7x:2x2x1
jax: 0.10.0
libtpu: 0.0.40
codegen_flags: <defaults>
</compile_context>

<pallas_src>
import functools

import jax
import jax.numpy as jnp
from jax import lax
from jax.experimental import pallas as pl
from jax.experimental.pallas import tpu as pltpu


TB_MAX = 8192                      # max batch tile (multiple of 512)
_CHUNK_CANDIDATES = (512, 384, 256, 128)


def _fc1_bf16_default():
    """Use bf16 VALU for fc1/ReLU only on generations that have it (v6e/v7x)."""
    try:
        kind = jax.devices()[0].device_kind.lower()
    except Exception:
        return True
    return not any(v in kind for v in ("v2", "v3", "v4", "v5"))


_FC1_BF16 = _fc1_bf16_default()


def _round_up(n, m):
    return ((n + m - 1) // m) * m


def _pick_tiles(batch):
    """Adaptive batch tile + in-kernel column chunk (both multiples of 128)."""
    rounded = _round_up(batch, 128)
    if rounded <= 512:
        tb = rounded                                   # tiny batch: one small tile
    else:
        # Aim for >= 2 grid steps (v7x TensorCore split), capped at TB_MAX so the
        # per-step tile stays cheap to double-buffer.
        tb = min(TB_MAX, _round_up(pl.cdiv(batch, 2), 128))
    chunk = tb if tb <= 512 else max(c for c in _CHUNK_CANDIDATES if tb % c == 0)
    return tb, chunk


def _mlp_kernel(xt_ref, w1_ref, b1_ref, w2_ref, b2_ref, w3t_ref, b3_ref, o_ref,
                *, chunk, fc1_bf16):
    tb = o_ref.shape[1]
    n_chunks = tb // chunk
    cdt = jnp.bfloat16 if fc1_bf16 else jnp.float32

    # Hoist resident-weight loads / column extracts / casts out of the chunk loop
    # (JAX does not CSE broadcast_in_dim, and these never change per chunk).
    w1 = w1_ref[...].astype(cdt)                       # (64, 3)
    w1c0, w1c1, w1c2 = w1[:, 0:1], w1[:, 1:2], w1[:, 2:3]
    b1 = b1_ref[...].astype(cdt)                       # (64, 1)
    w2 = w2_ref[...]                                   # (64, 64) bf16
    b2 = b2_ref[...]                                   # (64, 1)  f32
    w3t = w3t_ref[...]                                 # (64, 1)  f32
    b3 = b3_ref[...]                                   # (1, 1)   f32

    def chunk_body(c, carry):
        start = pl.multiple_of(c * chunk, 128)
        xt = xt_ref[:, pl.ds(start, chunk)].astype(cdt)            # (3, chunk)

        # fc1 (K=3): three VPU broadcast-FMAs; an MXU matmul would be ~all padding.
        h = w1c0 * xt[0:1, :] + w1c1 * xt[1:2, :] + w1c2 * xt[2:3, :] + b1
        h = jnp.maximum(h, 0).astype(jnp.bfloat16)                 # (64, chunk)

        # fc2: the only MXU matmul (bf16 operands, f32 accumulation).
        h2 = jnp.dot(w2, h, preferred_element_type=jnp.float32)    # (64, chunk)
        h2 = jnp.maximum(h2 + b2, 0.0)

        # fc3 (N=1): VPU multiply + sublane reduce -> lane-dense (1, chunk) result.
        y = jnp.sum(h2 * w3t, axis=0, keepdims=True) + b3
        o_ref[:, pl.ds(start, chunk)] = y.astype(o_ref.dtype)
        return carry

    lax.fori_loop(0, n_chunks, chunk_body, 0, unroll=n_chunks <= 8)


@jax.jit
def simple_nn_forward(x, w1, b1, w2, b2, w3, b3):
    """Forward pass of SimpleNN. Params are in PyTorch nn.Linear layout."""
    batch = x.shape[0]
    tb, chunk = _pick_tiles(batch)
    grid_n = pl.cdiv(batch, tb)
    b_pad = grid_n * tb

    # Batch along lanes: (features, batch) layout, zero-padded to a tile multiple.
    # TODO(synk): accept x already as (3, batch) upstream (or use allow_input_fusion)
    # to fold this pad+transpose HBM pass into the pallas_call operand.
    xt = jnp.pad(x.T, ((0, 0), (0, b_pad - batch)))     # (3, b_pad) f32
    b1c = b1.reshape(-1, 1)                             # (64, 1)
    b2c = b2.reshape(-1, 1)                             # (64, 1)
    w3t = w3.T                                          # (64, 1)
    b3c = b3.reshape(1, 1)                              # (1, 1)
    w2b = w2.astype(jnp.bfloat16)                       # bf16 MXU operand

    # Full-array blocks with a constant index_map: VMEM-resident, fetched once.
    resident = lambda a: pl.BlockSpec(a.shape, lambda i: (0,) * a.ndim)

    kernel = functools.partial(_mlp_kernel, chunk=chunk, fc1_bf16=_FC1_BF16)

    flops = 2 * batch * (3 * 64 + 64 * 64 + 64 * 1)
    bytes_accessed = ((x.size + b_pad) * 4
                      + (w1.size + b1.size + b2.size + w3.size + b3.size) * 4
                      + w2.size * 2)

    out_t = pl.pallas_call(
        kernel,
        out_shape=jax.ShapeDtypeStruct((1, b_pad), jnp.float32),
        grid=(grid_n,),
        in_specs=[
            pl.BlockSpec((3, tb), lambda i: (0, i)),     # x tile, pipelined
            resident(w1), resident(b1c), resident(w2b),
            resident(b2c), resident(w3t), resident(b3c),
        ],
        out_specs=pl.BlockSpec((1, tb), lambda i: (0, i)),   # lane-dense output
        compiler_params=pltpu.CompilerParams(
            dimension_semantics=("parallel",),
            vmem_limit_bytes=32 << 20),                  # chunked usage is <1 MiB
        cost_estimate=pl.CostEstimate(flops=flops, transcendentals=0,
                                      bytes_accessed=bytes_accessed),
    )(xt, w1, b1c, w2b, b2c, w3t, b3c)

    return out_t[0, :batch].reshape(batch, 1)


def _reference_forward(x, w1, b1, w2, b2, w3, b3):
    """Pure-JAX f32 reference matching the PyTorch module exactly."""
    h = jnp.maximum(x @ w1.T + b1, 0.0)
    h = jnp.maximum(h @ w2.T + b2, 0.0)
    return h @ w3.T + b3


def init_params(key):
    """PyTorch nn.Linear default init: U(-1/sqrt(fan_in), 1/sqrt(fan_in))."""
    def linear(k, fan_in, fan_out):
        kw, kb = jax.random.split(k)
        bound = float(fan_in) ** -0.5
        w = jax.random.uniform(kw, (fan_out, fan_in), jnp.float32, -bound, bound)
        b = jax.random.uniform(kb, (fan_out,), jnp.float32, -bound, bound)
        return w, b

    k1, k2, k3 = jax.random.split(key, 3)
    w1, b1 = linear(k1, 3, 64)
    w2, b2 = linear(k2, 64, 64)
    w3, b3 = linear(k3, 64, 1)
    return w1, b1, w2, b2, w3, b3


if __name__ == "__main__":
    key = jax.random.PRNGKey(0)
    k_param, k_x1, k_x2 = jax.random.split(key, 3)
    params = init_params(k_param)

    # bf16 operands on the MXU (and on the VPU for fc1 on v6e/v7x) with f32
    # accumulation => relaxed tolerance vs. the f32 reference.
    ATOL, RTOL = 1e-1, 5e-2

    # Small batch (8 samples, 3 input features) — single-tile, single-chunk path.
    x = jax.random.normal(k_x1, (8, 3), dtype=jnp.float32)
    out = jax.block_until_ready(simple_nn_forward(x, *params))
    ref = _reference_forward(x, *params)
    assert out.shape == (8, 1)
    assert jnp.allclose(out, ref, atol=ATOL, rtol=RTOL), (
        f"max abs err {float(jnp.max(jnp.abs(out - ref)))}")

    # Larger batch exercising the multi-step grid, inner chunk loop, and padding.
    x2 = jax.random.normal(k_x2, (1040, 3), dtype=jnp.float32)
    out2 = jax.block_until_ready(simple_nn_forward(x2, *params))
    ref2 = _reference_forward(x2, *params)
    assert out2.shape == (1040, 1)
    assert jnp.allclose(out2, ref2, atol=ATOL, rtol=RTOL), (
        f"max abs err {float(jnp.max(jnp.abs(out2 - ref2)))}")

    print("KERNEL_OK")
</pallas_src>

<mosaic_0001>
module attributes {stable_mosaic.version = 11 : i64} {
  func.func @_mlp_kernel(%arg0: i32, %arg1: memref<3x128xf32, #tpu.memory_space<vmem>>, %arg2: memref<64x3xf32, #tpu.memory_space<vmem>>, %arg3: memref<64x1xf32, #tpu.memory_space<vmem>>, %arg4: memref<64x64xbf16, #tpu.memory_space<vmem>>, %arg5: memref<64x1xf32, #tpu.memory_space<vmem>>, %arg6: memref<64x1xf32, #tpu.memory_space<vmem>>, %arg7: memref<1x1xf32, #tpu.memory_space<vmem>>, %arg8: memref<1x128xf32, #tpu.memory_space<vmem>>) attributes {dimension_semantics = [#tpu.dimension_semantics<parallel>], iteration_bounds = array<i64: 1>, scalar_prefetch = 0 : i64, scratch_operands = 0 : i64, tpu.core_type = #tpu.core_type<tc>, window_params = [{transform_indices = @transform_0, window_bounds = array<i64: 3, 128>}, {pipeline_mode = #tpu.pipeline_mode<synchronous>, transform_indices = @transform_1, window_bounds = array<i64: 64, 3>}, {pipeline_mode = #tpu.pipeline_mode<synchronous>, transform_indices = @transform_2, window_bounds = array<i64: 64, 1>}, {pipeline_mode = #tpu.pipeline_mode<synchronous>, transform_indices = @transform_3, window_bounds = array<i64: 64, 64>}, {pipeline_mode = #tpu.pipeline_mode<synchronous>, transform_indices = @transform_4, window_bounds = array<i64: 64, 1>}, {pipeline_mode = #tpu.pipeline_mode<synchronous>, transform_indices = @transform_5, window_bounds = array<i64: 64, 1>}, {pipeline_mode = #tpu.pipeline_mode<synchronous>, transform_indices = @transform_6, window_bounds = array<i64: 1, 1>}, {transform_indices = @transform_7, window_bounds = array<i64: 1, 128>}]} {
    %c0 = arith.constant 0 : index
    %c0_0 = arith.constant 0 : index
    %0 = vector.load %arg2[%c0, %c0_0] : memref<64x3xf32, #tpu.memory_space<vmem>>, vector<64x3xf32>
    %1 = arith.truncf %0 : vector<64x3xf32> to vector<64x3xbf16>
    %2 = vector.extract_strided_slice %1 {offsets = [0, 0], sizes = [64, 1], strides = [1, 1]} : vector<64x3xbf16> to vector<64x1xbf16>
    %3 = vector.extract_strided_slice %1 {offsets = [0, 1], sizes = [64, 1], strides = [1, 1]} : vector<64x3xbf16> to vector<64x1xbf16>
    %4 = vector.extract_strided_slice %1 {offsets = [0, 2], sizes = [64, 1], strides = [1, 1]} : vector<64x3xbf16> to vector<64x1xbf16>
    %c0_1 = arith.constant 0 : index
    %c0_2 = arith.constant 0 : index
    %5 = vector.load %arg3[%c0_1, %c0_2] : memref<64x1xf32, #tpu.memory_space<vmem>>, vector<64x1xf32>
    %6 = arith.truncf %5 : vector<64x1xf32> to vector<64x1xbf16>
    %c0_3 = arith.constant 0 : index
    %c0_4 = arith.constant 0 : index
    %7 = vector.load %arg4[%c0_3, %c0_4] : memref<64x64xbf16, #tpu.memory_space<vmem>>, vector<64x64xbf16>
    %c0_5 = arith.constant 0 : index
    %c0_6 = arith.constant 0 : index
    %8 = vector.load %arg5[%c0_5, %c0_6] : memref<64x1xf32, #tpu.memory_space<vmem>>, vector<64x1xf32>
    %c0_7 = arith.constant 0 : index
    %c0_8 = arith.constant 0 : index
    %9 = vector.load %arg6[%c0_7, %c0_8] : memref<64x1xf32, #tpu.memory_space<vmem>>, vector<64x1xf32>
    %c0_9 = arith.constant 0 : index
    %c0_10 = arith.constant 0 : index
    %10 = vector.load %arg7[%c0_9, %c0_10] : memref<1x1xf32, #tpu.memory_space<vmem>>, vector<1x1xf32>
    %c0_i32 = arith.constant 0 : i32
    %c128_i32 = arith.constant 128 : i32
    %11 = arith.muli %c0_i32, %c128_i32 : i32
    %12 = tpu.assume_multiple %11, 128 : i32
    %c0_11 = arith.constant 0 : index
    %13 = arith.index_cast %12 : i32 to index
    %14 = vector.load %arg1[%c0_11, %13] : memref<3x128xf32, #tpu.memory_space<vmem>>, vector<3x128xf32>
    %15 = arith.truncf %14 : vector<3x128xf32> to vector<3x128xbf16>
    %16 = vector.extract_strided_slice %15 {offsets = [0, 0], sizes = [1, 128], strides = [1, 1]} : vector<3x128xbf16> to vector<1x128xbf16>
    %17 = vector.broadcast %2 : vector<64x1xbf16> to vector<64x128xbf16>
    %18 = vector.broadcast %16 : vector<1x128xbf16> to vector<64x128xbf16>
    %19 = arith.mulf %17, %18 : vector<64x128xbf16>
    %20 = vector.extract_strided_slice %15 {offsets = [1, 0], sizes = [1, 128], strides = [1, 1]} : vector<3x128xbf16> to vector<1x128xbf16>
    %21 = vector.broadcast %3 : vector<64x1xbf16> to vector<64x128xbf16>
    %22 = vector.broadcast %20 : vector<1x128xbf16> to vector<64x128xbf16>
    %23 = arith.mulf %21, %22 : vector<64x128xbf16>
    %24 = arith.addf %19, %23 : vector<64x128xbf16>
    %25 = vector.extract_strided_slice %15 {offsets = [2, 0], sizes = [1, 128], strides = [1, 1]} : vector<3x128xbf16> to vector<1x128xbf16>
    %26 = vector.broadcast %4 : vector<64x1xbf16> to vector<64x128xbf16>
    %27 = vector.broadcast %25 : vector<1x128xbf16> to vector<64x128xbf16>
    %28 = arith.mulf %26, %27 : vector<64x128xbf16>
    %29 = arith.addf %24, %28 : vector<64x128xbf16>
    %30 = vector.broadcast %6 : vector<64x1xbf16> to vector<64x128xbf16>
    %31 = arith.addf %29, %30 : vector<64x128xbf16>
    %cst = arith.constant 0.000000e+00 : bf16
    %32 = vector.broadcast %cst : bf16 to vector<64x128xbf16>
    %33 = arith.maximumf %31, %32 : vector<64x128xbf16>
    %cst_12 = arith.constant dense<0.000000e+00> : vector<64x128xf32>
    %34 = tpu.matmul %7, %33, %cst_12 {dimension_numbers = #tpu.dot_dimension_numbers<[1], [0], [0], [1], [0, 0, 1, 1], [], []>} : vector<64x64xbf16>, vector<64x128xbf16>, vector<64x128xf32> -> vector<64x128xf32>
    %35 = vector.broadcast %8 : vector<64x1xf32> to vector<64x128xf32>
    %36 = arith.addf %34, %35 : vector<64x128xf32>
    %cst_13 = arith.constant 0.000000e+00 : f32
    %37 = vector.broadcast %cst_13 : f32 to vector<64x128xf32>
    %38 = arith.maximumf %36, %37 : vector<64x128xf32>
    %39 = vector.broadcast %9 : vector<64x1xf32> to vector<64x128xf32>
    %40 = arith.mulf %38, %39 : vector<64x128xf32>
    %cst_14 = arith.constant dense<0.000000e+00> : vector<128xf32>
    %41 = vector.multi_reduction <add>, %40, %cst_14 [0] : vector<64x128xf32> to vector<128xf32>
    %42 = vector.shape_cast %41 : vector<128xf32> to vector<1x128xf32>
    %43 = vector.broadcast %10 : vector<1x1xf32> to vector<1x128xf32>
    %44 = arith.addf %42, %43 : vector<1x128xf32>
    %c0_15 = arith.constant 0 : index
    %45 = arith.index_cast %12 : i32 to index
    %46 = vector.load %arg8[%c0_15, %45] : memref<1x128xf32, #tpu.memory_space<vmem>>, vector<1x128xf32>
    tpu.vector_store %arg8[%c0_15, %45], %44 {strides = array<i32>} : memref<1x128xf32, #tpu.memory_space<vmem>>, vector<1x128xf32>,
    %c1_i32 = arith.constant 1 : i32
    return
  }
  func.func @transform_0(%arg0: i32) -> (i32, i32) {
    %c0_i32 = arith.constant 0 : i32
    %c0_i32_0 = arith.constant 0 : i32
    return %c0_i32, %arg0 : i32, i32
  }
  func.func @transform_1(%arg0: i32) -> (i32, i32) {
    %c0_i32 = arith.constant 0 : i32
    %c0_i32_0 = arith.constant 0 : i32
    %c0_i32_1 = arith.constant 0 : i32
    return %c0_i32, %c0_i32_0 : i32, i32
  }
  func.func @transform_2(%arg0: i32) -> (i32, i32) {
    %c0_i32 = arith.constant 0 : i32
    %c0_i32_0 = arith.constant 0 : i32
    %c0_i32_1 = arith.constant 0 : i32
    return %c0_i32, %c0_i32_0 : i32, i32
  }
  func.func @transform_3(%arg0: i32) -> (i32, i32) {
    %c0_i32 = arith.constant 0 : i32
    %c0_i32_0 = arith.constant 0 : i32
    %c0_i32_1 = arith.constant 0 : i32
    return %c0_i32, %c0_i32_0 : i32, i32
  }
  func.func @transform_4(%arg0: i32) -> (i32, i32) {
    %c0_i32 = arith.constant 0 : i32
    %c0_i32_0 = arith.constant 0 : i32
    %c0_i32_1 = arith.constant 0 : i32
    return %c0_i32, %c0_i32_0 : i32, i32
  }
  func.func @transform_5(%arg0: i32) -> (i32, i32) {
    %c0_i32 = arith.constant 0 : i32
    %c0_i32_0 = arith.constant 0 : i32
    %c0_i32_1 = arith.constant 0 : i32
    return %c0_i32, %c0_i32_0 : i32, i32
  }
  func.func @transform_6(%arg0: i32) -> (i32, i32) {
    %c0_i32 = arith.constant 0 : i32
    %c0_i32_0 = arith.constant 0 : i32
    %c0_i32_1 = arith.constant 0 : i32
    return %c0_i32, %c0_i32_0 : i32, i32
  }
  func.func @transform_7(%arg0: i32) -> (i32, i32) {
    %c0_i32 = arith.constant 0 : i32
    %c0_i32_0 = arith.constant 0 : i32
    return %c0_i32, %arg0 : i32, i32
  }
}

</mosaic_0001>

<bundles_post_ra>
// kernel: simple_nn_forward.1
= control target key start
LH: loop header
LB: loop body
LE: loop exit
PB: predicated region body
PF: predicated region fallthrough
CT: control target
= control target key end

     0   :  { %v480_v0 = vmov 2   ;;  %v481_v1 = vmov 0   ;;  %v482_v13 = vmov 1   ;;  %vm258_vm0 = vcmask 523264   ;;  %s659_s1 = inlined_call_operand.vmem [shape: f32[64,3], index: 1, kind: input, shape index: {}]   ;;  %s660_s6 = inlined_call_operand.<no memory space> [shape: f32[1,1], index: 6, kind: input, shape index: {}]   ;;  %s661_s2 = inlined_call_operand.vmem [shape: f32[64,1], index: 2, kind: input, shape index: {}]   ;;  %s662_s4 = inlined_call_operand.vmem [shape: f32[64,1], index: 4, kind: input, shape index: {}]   ;;  %s663_s5 = inlined_call_operand.vmem [shape: f32[64,1], index: 5, kind: input, shape index: {}]   ;;  %s664_s3 = inlined_call_operand.vmem [shape: bf16[64,64], index: 3, kind: input, shape index: {}]   ;;  %s665_s0 = inlined_call_operand.vmem [shape: f32[3,128], index: 0, kind: input, shape index: {}]   ;;  %s666_s7 = inlined_call_operand.vmem [shape: f32[1,128], index: 7, kind: output, shape index: {}]  }
   0x1   :  { %464 = vset.pattern.permute.xlu1 %v480_v0  ;;  %463 = vset.pattern.permute.xlu0 %v481_v1  ;;  %v29_v2 = vld [vmem:[%s659_s1] sm:$0xff]  ;;  %v30_v3 = vld [vmem:[%s659_s1 + $0x8] sm:$0xff]  ;;  %v12_v4 = vstv %s660_s6  ;;  %v31_v6 = vld [vmem:[%s659_s1 + $0x10] sm:$0xff]  ;;  %v103_v48 = vlaneseq }
   0x2   :  { %v37_v5 = vpack.c.bf16 %v30_v3, %v29_v2  ;;  %v32_v7 = vld [vmem:[%s659_s1 + $0x18] sm:$0xff]  ;;  %13 = vst [vmem:[#allocation2] sm:$0x1] %v12_v4  ;;  %v33_v9 = vld [vmem:[%s659_s1 + $0x20] sm:$0xff]  ;;  %v34_v10 = vld [vmem:[%s659_s1 + $0x28] sm:$0xff] }
   0x3   :  { %v38_v8 = vpack.c.bf16 %v32_v7, %v31_v6  ;;  %v41_v11 = vld [vmem:[%s661_s2] sm:$0xff]  ;;  %v42_v12 = vld [vmem:[%s661_s2 + $0x8] sm:$0xff]  ;;  %v39_v14 = vpack.c.bf16 %v34_v10, %v33_v9  ;;  %v35_v16 = vld [vmem:[%s659_s1 + $0x30] sm:$0xff]  ;;  %v104_v53 = vshrl.u32 %v103_v48, 7 }
   0x4   :  { %143 = vperm.xlu1 %464, %v37_v5   ;;  %82 = vperm.xlu0 %463, %v37_v5   ;;  %v49_v15 = vpack.c.bf16 %v42_v12, %v41_v11  ;;  %v36_v17 = vld [vmem:[%s659_s1 + $0x38] sm:$0xff]  ;;  %v45_v19 = vld [vmem:[%s661_s2 + $0x20] sm:$0xff]  ;;  %v46_v20 = vld [vmem:[%s661_s2 + $0x28] sm:$0xff] }
   0x5   :  { %v40_v18 = vpack.c.bf16 %v36_v17, %v35_v16  ;;  %v51_v21 = vpack.c.bf16 %v46_v20, %v45_v19  ;;  %v43_v22 = vld [vmem:[%s661_s2 + $0x10] sm:$0xff]  ;;  %v44_v23 = vld [vmem:[%s661_s2 + $0x18] sm:$0xff]  ;;  %v61_v24 = vld [vmem:[%s662_s4] sm:$0xff]  ;;  %v639_v54 = vsub.s32 0, %v104_v53  ;;  %v160_v56 = vsub.s32 1, %v104_v53 }
   0x6   :  { %v50_v25 = vpack.c.bf16 %v44_v23, %v43_v22  ;;  %v63_v26 = vld [vmem:[%s662_s4 + $0x10] sm:$0xff]  ;;  %v69_v27 = vld [vmem:[%s663_s5] sm:$0xff]  ;;  %v48_v30 = vld [vmem:[%s661_s2 + $0x38] sm:$0xff] }
   0x7   :  { %v65_v28 = vld [vmem:[%s662_s4 + $0x20] sm:$0xff]  ;;  %v47_v29 = vld [vmem:[%s661_s2 + $0x30] sm:$0xff]  ;;  %v66_v31 = vld [vmem:[%s662_s4 + $0x28] sm:$0xff] }
   0x8   :  { %465 = vset.pattern.permute.xlu1 %v481_v1  ;;  %467 = vset.pattern.permute.xlu0 %v480_v0  ;;  %v52_v32 = vpack.c.bf16 %v48_v30, %v47_v29  ;;  %v67_v33 = vld [vmem:[%s662_s4 + $0x30] sm:$0xff]  ;;  %v62_v34 = vld [vmem:[%s662_s4 + $0x8] sm:$0xff]  ;;  %v68_v35 = vld [vmem:[%s662_s4 + $0x38] sm:$0xff] }
   0x9   :  { %87 = vperm.xlu1 %465, %v38_v8   ;;  %147 = vperm.xlu0 %467, %v38_v8   ;;  %v64_v36 = vld [vmem:[%s662_s4 + $0x18] sm:$0xff]  ;;  %v476_v37 = vld [vmem:[%s664_s3] sm:$0xff]   ;;  %v477_v38 = vld [vmem:[%s664_s3 + $0x10] sm:$0xff]  }
   0xa   :  { %444 = vmatprep.mubr.msk.bf16.mxu0 %vm258_vm0, %v476_v37  ;;  %v75_v39 = vld [vmem:[%s663_s5 + $0x30] sm:$0xff]  ;;  %448 = vmatprep.mubr.msk.bf16.mxu1 %vm258_vm0, %v477_v38  ;;  %v70_v40 = vld [vmem:[%s663_s5 + $0x8] sm:$0xff]  ;;  %v77_v41 = vld [vmem:[#allocation2] sm:$0x1] }
   0xb   :  { %v71_v42 = vld [vmem:[%s663_s5 + $0x10] sm:$0xff]  ;;  %v72_v43 = vld [vmem:[%s663_s5 + $0x18] sm:$0xff]  ;;  %v73_v44 = vld [vmem:[%s663_s5 + $0x20] sm:$0xff] }
   0xc   :  { %v74_v45 = vld [vmem:[%s663_s5 + $0x28] sm:$0xff]  ;;  %v76_v46 = vld [vmem:[%s663_s5 + $0x38] sm:$0xff]  ;;  %v78_v47 = vld [vmem:[%s665_s0] sm:$0x7] }
   0xd   :  { %466 = vset.pattern.permute.xlu1 %v482_v13  ;;  %468 = vset.pattern.permute.xlu0 %v482_v13  ;;  %v79_v49 = vpack.c.bf16 %v78_v47, %v78_v47 }
   0xe   :  { %116 = vperm.xlu1 %466, %v38_v8   ;;  %112 = vperm.xlu0 %468, %v37_v5  }
   0xf   :  { %v127_v50 = vshrl.u32 %v79_v49, 16  ;;  %v101_v57 = vpack.i.b16 %v79_v49, %v79_v49 }
  0x11   :  { %v128_v55 = vpack.i.b16 %v127_v50, %v127_v50  ;;  %v106_v60 = vrot.slane %v101_v57, %v639_v54  ;;  %v161_v62 = vrot.slane %v101_v57, %v160_v56 }
  0x12   :  { %469 = vset.pattern.permute.xlu1 %v481_v1  ;;  %120 = vperm.xlu0 %468, %v39_v14  }
  0x13   :  { %172 = vperm.xlu1 %469, %v49_v15   ;;  %v133_v61 = vrot.slane %v128_v55, %v639_v54 }
  0x16   :  { %472 = vset.pattern.permute.xlu0 %v481_v1 }
  0x17   :  { %92 = vperm.xlu1 %469, %v39_v14   ;;  %97 = vperm.xlu0 %472, %v40_v18  }
  0x1b   :  { %470 = vset.pattern.permute.xlu1 %v480_v0  ;;  %182 = vperm.xlu0 %472, %v51_v21  }
  0x1c   :  { %151 = vperm.xlu1 %470, %v39_v14  }
  0x1f   :  { %200 = vperm.xlu0 %472, %v61_v24  }
  0x20   :  { %471 = vset.pattern.permute.xlu1 %v481_v1 }
  0x21   :  { %177 = vperm.xlu1 %471, %v50_v25  }
  0x23   :  { %210 = vperm.xlu0 %472, %v63_v26  }
  0x25   :  { %473 = vset.pattern.permute.xlu1 %v482_v13 }
  0x26   :  { %124 = vperm.xlu1 %473, %v40_v18  }
  0x27   :  { %346 = vperm.xlu0 %472, %v69_v27  }
  0x2a   :  { %474 = vset.pattern.permute.xlu1 %v480_v0 }
  0x2b   :  { %155 = vperm.xlu1 %474, %v40_v18   ;;  %220 = vperm.xlu0 %472, %v65_v28  }
  0x2f   :  { %475 = vset.pattern.permute.xlu1 %v481_v1  ;;  %225 = vperm.xlu0 %472, %v66_v31  }
  0x30   :  { %187 = vperm.xlu1 %475, %v52_v32  }
  0x33   :  { %230 = vperm.xlu0 %472, %v67_v33  }
  0x34   :  { %205 = vperm.xlu1 %475, %v62_v34  }
  0x37   :  { %235 = vperm.xlu0 %472, %v68_v35  }
  0x38   :  { %215 = vperm.xlu1 %475, %v64_v36  }
  0x3b   :  { %376 = vperm.xlu0 %472, %v75_v39  }
  0x3c   :  { %351 = vperm.xlu1 %475, %v70_v40   ;;  %v478_v40 = vld [vmem:[%s664_s3 + $0x8] sm:$0xff]  }
  0x3f   :  { %407 = vperm.xlu0 %472, %v77_v41   ;;  %v479_v41 = vld [vmem:[%s664_s3 + $0x18] sm:$0xff]  }
  0x40   :  { %356 = vperm.xlu1 %475, %v71_v42  }
  0x44   :  { %361 = vperm.xlu1 %475, %v72_v43  }
  0x48   :  { %366 = vperm.xlu1 %475, %v73_v44  }
  0x4c   :  { %371 = vperm.xlu1 %475, %v74_v45  }
  0x50   :  { %381 = vperm.xlu1 %475, %v76_v46  }
  0x83   :  { %v144_v51 = vpop.permute.xlu1 %143  ;;  %v83_v52 = vpop.permute.xlu0 %82 }
  0x84   :  { %v107_v63 = vmul.bf16 %v106_v60, %v83_v52  ;;  %v162_v4 = vmul.bf16 %v161_v62, %v144_v51 }
  0x88   :  { %v88_v58 = vpop.permute.xlu1 %87  ;;  %v148_v59 = vpop.permute.xlu0 %147 }
  0x89   :  { %v108_v15 = vmul.bf16 %v106_v60, %v88_v58  ;;  %v163_v17 = vmul.bf16 %v161_v62, %v148_v59 }
  0x8d   :  { %v117_v0 = vpop.permute.xlu1 %116  ;;  %v113_v2 = vpop.permute.xlu0 %112 }
  0x8e   :  { %v134_v3 = vmul.bf16 %v133_v61, %v113_v2  ;;  %v135_v12 = vmul.bf16 %v133_v61, %v117_v0 }
  0x90   :  { %v138_v5 = vadd.bf16 %v134_v3, %v107_v63  ;;  %v139_v18 = vadd.bf16 %v135_v12, %v108_v15 }
  0x91   :  { %v121_v9 = vpop.permute.xlu0 %120 }
  0x92   :  { %v173_v6 = vpop.permute.xlu1 %172  ;;  %v166_v7 = vadd.bf16 %v162_v4, %v138_v5  ;;  %v136_v13 = vmul.bf16 %v133_v61, %v121_v9  ;;  %v167_v23 = vadd.bf16 %v163_v17, %v139_v18 }
  0x94   :  { %v190_v8 = vadd.bf16 %v173_v6, %v166_v7 }
  0x96   :  { %v194_v10 = vmax.bf16 %v481_v1, %v190_v8  ;;  %v93_v11 = vpop.permute.xlu1 %92  ;;  %v98_v16 = vpop.permute.xlu0 %97 }
  0x97   :  { %v109_v14 = vmul.bf16 %v106_v60, %v93_v11  ;;  %v110_v31 = vmul.bf16 %v106_v60, %v98_v16 }
  0x98   :  { %436 = vmatprep.subr.bf16.mxu0 %v194_v10  ;;  %452 = vmatprep.subr.bf16.mxu1 %v194_v10 }
  0x99   :  { %437 = vmatpush3.bf16.msra.mxu0 %v194_v10  ;;  %456 = vmatpush3.bf16.msra.mxu1 %v194_v10  ;;  %v140_v20 = vadd.bf16 %v136_v13, %v109_v14 }
  0x9a   :  { %v183_v24 = vpop.permute.xlu0 %182 }
  0x9b   :  { %v152_v19 = vpop.permute.xlu1 %151 }
  0x9c   :  { %v164_v21 = vmul.bf16 %v161_v62, %v152_v19 }
  0x9e   :  { %v168_v22 = vadd.bf16 %v164_v21, %v140_v20  ;;  %v201_v42 = vpop.permute.xlu0 %200 }
  0xa0   :  { %v178_v25 = vpop.permute.xlu1 %177  ;;  %v192_v26 = vadd.bf16 %v183_v24, %v168_v22 }
  0xa1   :  { %v191_v27 = vadd.bf16 %v178_v25, %v167_v23 }
  0xa2   :  { %v196_v29 = vmax.bf16 %v481_v1, %v192_v26  ;;  %v211_v44 = vpop.permute.xlu0 %210 }
  0xa3   :  { %v195_v28 = vmax.bf16 %v481_v1, %v191_v27 }
  0xa5   :  { %v125_v30 = vpop.permute.xlu1 %124  ;;  %438 = vmatprep.subr.bf16.mxu0 %v195_v28  ;;  %453 = vmatprep.subr.bf16.mxu1 %v195_v28 }
  0xa6   :  { %439 = vmatpush3.bf16.msra.mxu0 %v195_v28  ;;  %457 = vmatpush3.bf16.msra.mxu1 %v195_v28  ;;  %v137_v32 = vmul.bf16 %v133_v61, %v125_v30  ;;  %v347_v45 = vpop.permute.xlu0 %346 }
  0xa7   :  { %440 = vmatprep.subr.bf16.mxu0 %v196_v29  ;;  %454 = vmatprep.subr.bf16.mxu1 %v196_v29 }
  0xa8   :  { %v141_v34 = vadd.bf16 %v137_v32, %v110_v31 }
  0xaa   :  { %v156_v33 = vpop.permute.xlu1 %155  ;;  %441 = vmatpush3.bf16.msra.mxu0 %v196_v29  ;;  %458 = vmatpush3.bf16.msra.mxu1 %v196_v29  ;;  %v221_v47 = vpop.permute.xlu0 %220 }
  0xab   :  { %v165_v35 = vmul.bf16 %v161_v62, %v156_v33 }
  0xad   :  { %v169_v36 = vadd.bf16 %v165_v35, %v141_v34 }
  0xae   :  { %v226_v49 = vpop.permute.xlu0 %225 }
  0xaf   :  { %v188_v37 = vpop.permute.xlu1 %187 }
  0xb0   :  { %v193_v38 = vadd.bf16 %v188_v37, %v169_v36 }
  0xb2   :  { %v197_v39 = vmax.bf16 %v481_v1, %v193_v38  ;;  %v231_v2 = vpop.permute.xlu0 %230 }
  0xb3   :  { %v206_v43 = vpop.permute.xlu1 %205 }
  0xb4   :  { %442 = vmatprep.subr.bf16.mxu0 %v197_v39  ;;  %455 = vmatprep.subr.bf16.mxu1 %v197_v39 }
  0xb5   :  { %443 = vmatpush3.bf16.msra.mxu0 %v197_v39  ;;  %459 = vmatpush3.bf16.msra.mxu1 %v197_v39 }
  0xb6   :  { %v236_v15 = vpop.permute.xlu0 %235 }
  0xb7   :  { %v216_v1 = vpop.permute.xlu1 %215 }
  0xb8   :  { %445 = vmatmul.mubr.msk.bf16.vlgmr.msra.gmra.mrb[0].mxu0 %vm258_vm0, %v478_v40  ;;  %449 = vmatmul.mubr.msk.bf16.vlgmr.msra.gmra.mrb[0].mxu1 %vm258_vm0, %v479_v41 }
  0xba   :  { %v377_v27 = vpop.permute.xlu0 %376 }
  0xbb   :  { %v352_v46 = vpop.permute.xlu1 %351 }
  0xbe   :  { %v408_v38 = vpop.permute.xlu0 %407 }
  0xbf   :  { %v357_v48 = vpop.permute.xlu1 %356  ;;  %v413_v40 = vrot.slane %v408_v38, %v639_v54 }
  0xc3   :  { %v362_v50 = vpop.permute.xlu1 %361 }
  0xc7   :  { %v367_v6 = vpop.permute.xlu1 %366 }
  0xcb   :  { %v372_v20 = vpop.permute.xlu1 %371 }
  0xcf   :  { %v382_v30 = vpop.permute.xlu1 %381 }
 0x18b   :  { %v446_v51 = vpop.f32.mrb[0].mxu0  ;;  %v450_v52 = vpop.f32.mrb[0].mxu1 }
 0x18c   :  { %v305_v53 = vpop.f32.mrb[1].mxu0  ;;  %v321_v55 = vpop.f32.mrb[1].mxu1  ;;  %v314_v56 = vadd.f32 %v446_v51, %v211_v44  ;;  %v330_v12 = vadd.f32 %v450_v52, %v231_v2 }
 0x18d   :  { %v306_v57 = vadd.f32 %v305_v53, %v201_v42  ;;  %v447_v58 = vpop.f32.mrb[2].mxu0  ;;  %v451_v59 = vpop.f32.mrb[2].mxu1  ;;  %v322_v4 = vadd.f32 %v321_v55, %v221_v47 }
 0x18e   :  { %v308_v60 = vpop.f32.mrb[3].mxu0  ;;  %v324_v61 = vpop.f32.mrb[3].mxu1  ;;  %v317_v63 = vadd.f32 %v447_v58, %v216_v1  ;;  %v338_v3 = vmax.f32 %v314_v56, 0.0  ;;  %v333_v17 = vadd.f32 %v451_v59, %v236_v15  ;;  %v342_v21 = vmax.f32 %v330_v12, 0.0 }
 0x18f   :  { %v336_v62 = vmax.f32 %v306_v57, 0.0  ;;  %v309_v0 = vadd.f32 %v308_v60, %v206_v43  ;;  %v325_v10 = vadd.f32 %v324_v61, %v226_v49  ;;  %v340_v13 = vmax.f32 %v322_v4, 0.0 }
 0x190   :  { %v339_v8 = vmax.f32 %v317_v63, 0.0  ;;  %v386_v11 = vmul.f32 %v357_v48, %v338_v3  ;;  %v343_v24 = vmax.f32 %v333_v17, 0.0  ;;  %v390_v28 = vmul.f32 %v377_v27, %v342_v21 }
 0x191   :  { %v337_v5 = vmax.f32 %v309_v0, 0.0  ;;  %v384_v7 = vmul.f32 %v347_v45, %v336_v62  ;;  %v341_v19 = vmax.f32 %v325_v10, 0.0  ;;  %v388_v22 = vmul.f32 %v367_v6, %v340_v13 }
 0x192   :  { %v387_v16 = vmul.f32 %v362_v50, %v339_v8  ;;  %v391_v31 = vmul.f32 %v382_v30, %v343_v24 }
 0x193   :  { %v385_v9 = vmul.f32 %v352_v46, %v337_v5  ;;  %v389_v25 = vmul.f32 %v372_v20, %v341_v19 }
 0x195   :  { %v392_v14 = vadd.f32 %v385_v9, %v384_v7 }
 0x197   :  { %v393_v18 = vadd.f32 %v392_v14, %v386_v11 }
 0x199   :  { %v394_v23 = vadd.f32 %v393_v18, %v387_v16 }
 0x19b   :  { %v395_v26 = vadd.f32 %v394_v23, %v388_v22 }
 0x19d   :  { %v396_v29 = vadd.f32 %v395_v26, %v389_v25 }
 0x19f   :  { %v397_v32 = vadd.f32 %v396_v29, %v390_v28 }
 0x1a1   :  { %v398_v33 = vadd.f32 %v397_v32, %v391_v31 }
 0x1a3   :  { %v399_v34 = vrot.slane %v398_v33, 4 }
 0x1a5   :  { %v400_v35 = vadd.f32 %v399_v34, %v398_v33 }
 0x1a7   :  { %v401_v36 = vrot.slane %v400_v35, 2 }
 0x1a9   :  { %v402_v37 = vadd.f32 %v401_v36, %v400_v35 }
 0x1ab   :  { %v403_v39 = vrot.slane %v402_v37, 1 }
 0x1ad   :  { %v404_v41 = vadd.f32 %v403_v39, %v402_v37 }
 0x1af   :  { %v414_v42 = vadd.f32 %v413_v40, %v404_v41 }
 0x1b1   :  { %415 = vst [vmem:[%s666_s7] sm:$0x1] %v414_v42 }

</bundles_post_ra>
